<compile_context>
chip_gen: v5e
topology: v5e:2x2
jax: 0.10.0
libtpu: 0.0.40
codegen_flags: <defaults>
</compile_context>

<pallas_src>
import jax
import jax.numpy as jnp
from jax.experimental import pallas as pl
from jax.experimental.pallas import tpu as pltpu

NEG_SLOPE = 0.01                 # PyTorch nn.LeakyReLU() default negative_slope
STREAM_DTYPE = jnp.bfloat16      # dtype of the HBM input/weight streams fed to the kernel


def _make_downsample_kernel(c_in, c_out, wph, out_len, use_mxu):
    # Tap table, indexed k = kh*3 + kw -> (phase_index, dh, dw):
    #   phase_index selects (ee, eo, oe, oo) = (row kh%2, col kw%2) parity plane,
    #   (dh, dw) = (kh//2, kw//2) are the shifts of that tap in phase coordinates.
    taps = (
        (0, 0, 0), (1, 0, 0), (0, 0, 1),
        (2, 0, 0), (3, 0, 0), (2, 0, 1),
        (0, 1, 0), (1, 1, 0), (0, 1, 1),
    )

    def kernel(ee_ref, eo_ref, oe_ref, oo_ref, w_ref, b_ref, o_ref):
        phases = (ee_ref, eo_ref, oe_ref, oo_ref)
        acc = jnp.zeros((c_out, out_len), jnp.float32)
        for k, (p, dh, dw) in enumerate(taps):
            start = dh * wph + dw                              # static offset
            tap = phases[p][0, :, pl.ds(start, out_len)]       # (c_in, out_len), bf16
            if use_mxu:
                acc = acc + jnp.dot(w_ref[k], tap,
                                    preferred_element_type=jnp.float32)
            else:
                # Tiny-C path: contraction as c_in VPU broadcast MACs (lane-dense),
                # everything in f32.
                wk = w_ref[k].astype(jnp.float32)              # (c_out, c_in)
                tap32 = tap.astype(jnp.float32)
                for ci in range(c_in):
                    acc = acc + wk[:, ci:ci + 1] * tap32[ci:ci + 1, :]
        y = acc + b_ref[...]                                   # (c_out, L) + (c_out, 1)
        y = jnp.where(y >= 0.0, y, NEG_SLOPE * y)              # LeakyReLU in f32
        o_ref[0] = y.astype(o_ref.dtype)

    return kernel


@jax.jit
def downsampling_forward(x_nchw, weight, bias):
    """Conv2d(C, C, 3, stride=2, padding=1) + LeakyReLU(0.01).

    x_nchw: (N, C, H, W); weight: (C, C, 3, 3) [PyTorch OIHW]; bias: (C,).
    Returns (N, C, OH, OW) in x's dtype.
    """
    N, C, H, W = x_nchw.shape
    OH = (H - 1) // 2 + 1
    OW = (W - 1) // 2 + 1

    # ---- wrapper-side layout (cheap, ~1x input traffic, no transposes) ----
    # Pad: top/left = 1 (conv padding), bottom/right with enough zeros that the
    # padded extents are exactly 2*(OH+2) x 2*(OW+1) (keeps all tap slices in bounds).
    pad_b = 2 * OH + 3 - H
    pad_r = 2 * OW + 1 - W
    xp = jnp.pad(x_nchw.astype(STREAM_DTYPE),
                 ((0, 0), (0, 0), (1, pad_b), (1, pad_r)))
    hph = OH + 2            # phase-plane height
    wph = OW + 1            # phase-plane width (one junk column per output row)
    sp = hph * wph
    phs = xp.reshape(N, C, hph, 2, wph, 2)
    x_ee = phs[:, :, :, 0, :, 0].reshape(N, C, sp)
    x_eo = phs[:, :, :, 0, :, 1].reshape(N, C, sp)
    x_oe = phs[:, :, :, 1, :, 0].reshape(N, C, sp)
    x_oo = phs[:, :, :, 1, :, 1].reshape(N, C, sp)

    # OIHW -> (kh*3+kw, c_out, c_in); bias stays exact f32 as (c_out, 1).
    w9 = jnp.transpose(weight, (2, 3, 0, 1)).reshape(9, C, C).astype(STREAM_DTYPE)
    b2 = bias.astype(jnp.float32).reshape(C, 1)

    out_len = OH * wph
    use_mxu = C >= 16       # tiny C -> VPU broadcast-MAC path (MXU would be ~idle)

    phase_spec = pl.BlockSpec((1, C, sp), lambda n: (n, 0, 0))
    out_flat = pl.pallas_call(
        _make_downsample_kernel(C, C, wph, out_len, use_mxu),
        out_shape=jax.ShapeDtypeStruct((N, C, out_len), x_nchw.dtype),
        grid_spec=pltpu.PrefetchScalarGridSpec(
            num_scalar_prefetch=0,
            grid=(N,),
            in_specs=[
                phase_spec, phase_spec, phase_spec, phase_spec,
                pl.BlockSpec((9, C, C), lambda n: (0, 0, 0)),   # resident weights
                pl.BlockSpec((C, 1), lambda n: (0, 0)),         # resident bias
            ],
            out_specs=pl.BlockSpec((1, C, out_len), lambda n: (n, 0, 0)),
        ),
        compiler_params=pltpu.CompilerParams(
            dimension_semantics=("parallel",),                  # images across TensorCores
            vmem_limit_bytes=64 * 1024 * 1024,                  # headroom for larger images
        ),
    )(x_ee, x_eo, x_oe, x_oo, w9, b2)

    # Drop the junk column per output row -> (N, C, OH, OW), still NCHW.
    return out_flat.reshape(N, C, OH, wph)[:, :, :, :OW]


def _reference(x_nchw, weight, bias):
    """Pure-JAX f32 reference (lax conv) for the correctness check."""
    y = jax.lax.conv_general_dilated(
        x_nchw, weight, window_strides=(2, 2), padding=((1, 1), (1, 1)),
        dimension_numbers=("NCHW", "OIHW", "NCHW"))
    y = y + bias.reshape(1, -1, 1, 1)
    return jnp.where(y >= 0.0, y, NEG_SLOPE * y)


if __name__ == "__main__":
    key = jax.random.PRNGKey(0)
    k_x, k_w, k_b = jax.random.split(key, 3)

    N, C, H, W = 2, 4, 16, 16
    x = jax.random.normal(k_x, (N, C, H, W), dtype=jnp.float32)
    # Conv2d(C, C, 3) parameter shapes: (C, C, 3, 3) and (C,)
    weight = jax.random.normal(k_w, (C, C, 3, 3), dtype=jnp.float32) * 0.1
    bias = jax.random.normal(k_b, (C,), dtype=jnp.float32) * 0.1

    out = jax.block_until_ready(downsampling_forward(x, weight, bias))
    ref = jax.block_until_ready(_reference(x, weight, bias))

    assert out.shape == (N, C, H // 2, W // 2), out.shape
    err = float(jnp.max(jnp.abs(out - ref)))
    # bf16 input/weight streams vs. the f32 reference -> loosened tolerance.
    assert jnp.allclose(out, ref, atol=5e-2, rtol=5e-2), err

    print("KERNEL_OK")
</pallas_src>

<mosaic_0001>
module attributes {stable_mosaic.version = 11 : i64} {
  func.func @kernel(%arg0: i32, %arg1: memref<1x4x90xbf16, #tpu.memory_space<vmem>>, %arg2: memref<1x4x90xbf16, #tpu.memory_space<vmem>>, %arg3: memref<1x4x90xbf16, #tpu.memory_space<vmem>>, %arg4: memref<1x4x90xbf16, #tpu.memory_space<vmem>>, %arg5: memref<9x4x4xbf16, #tpu.memory_space<vmem>>, %arg6: memref<4x1xf32, #tpu.memory_space<vmem>>, %arg7: memref<1x4x72xf32, #tpu.memory_space<vmem>>) attributes {dimension_semantics = [#tpu.dimension_semantics<parallel>], iteration_bounds = array<i64: 2>, scalar_prefetch = 0 : i64, scratch_operands = 0 : i64, tpu.core_type = #tpu.core_type<tc>, window_params = [{transform_indices = @transform_0, window_bounds = array<i64: 1, 4, 90>}, {transform_indices = @transform_1, window_bounds = array<i64: 1, 4, 90>}, {transform_indices = @transform_2, window_bounds = array<i64: 1, 4, 90>}, {transform_indices = @transform_3, window_bounds = array<i64: 1, 4, 90>}, {pipeline_mode = #tpu.pipeline_mode<synchronous>, transform_indices = @transform_4, window_bounds = array<i64: 9, 4, 4>}, {pipeline_mode = #tpu.pipeline_mode<synchronous>, transform_indices = @transform_5, window_bounds = array<i64: 4, 1>}, {transform_indices = @transform_6, window_bounds = array<i64: 1, 4, 72>}]} {
    %cst = arith.constant 0.000000e+00 : f32
    %0 = vector.broadcast %cst : f32 to vector<4x72xf32>
    %c0 = arith.constant 0 : index
    %c0_0 = arith.constant 0 : index
    %c0_1 = arith.constant 0 : index
    %1 = vector.load %arg1[%c0, %c0_0, %c0_1] : memref<1x4x90xbf16, #tpu.memory_space<vmem>>, vector<1x4x72xbf16>
    %2 = vector.shape_cast %1 : vector<1x4x72xbf16> to vector<4x72xbf16>
    %c0_2 = arith.constant 0 : index
    %c0_3 = arith.constant 0 : index
    %c0_4 = arith.constant 0 : index
    %3 = vector.load %arg5[%c0_2, %c0_3, %c0_4] : memref<9x4x4xbf16, #tpu.memory_space<vmem>>, vector<1x4x4xbf16>
    %4 = vector.shape_cast %3 : vector<1x4x4xbf16> to vector<4x4xbf16>
    %5 = arith.extf %4 : vector<4x4xbf16> to vector<4x4xf32>
    %6 = arith.extf %2 : vector<4x72xbf16> to vector<4x72xf32>
    %7 = vector.extract_strided_slice %5 {offsets = [0, 0], sizes = [4, 1], strides = [1, 1]} : vector<4x4xf32> to vector<4x1xf32>
    %8 = vector.extract_strided_slice %6 {offsets = [0, 0], sizes = [1, 72], strides = [1, 1]} : vector<4x72xf32> to vector<1x72xf32>
    %9 = vector.broadcast %7 : vector<4x1xf32> to vector<4x72xf32>
    %10 = vector.broadcast %8 : vector<1x72xf32> to vector<4x72xf32>
    %11 = arith.mulf %9, %10 : vector<4x72xf32>
    %12 = arith.addf %0, %11 : vector<4x72xf32>
    %13 = vector.extract_strided_slice %5 {offsets = [0, 1], sizes = [4, 1], strides = [1, 1]} : vector<4x4xf32> to vector<4x1xf32>
    %14 = vector.extract_strided_slice %6 {offsets = [1, 0], sizes = [1, 72], strides = [1, 1]} : vector<4x72xf32> to vector<1x72xf32>
    %15 = vector.broadcast %13 : vector<4x1xf32> to vector<4x72xf32>
    %16 = vector.broadcast %14 : vector<1x72xf32> to vector<4x72xf32>
    %17 = arith.mulf %15, %16 : vector<4x72xf32>
    %18 = arith.addf %12, %17 : vector<4x72xf32>
    %19 = vector.extract_strided_slice %5 {offsets = [0, 2], sizes = [4, 1], strides = [1, 1]} : vector<4x4xf32> to vector<4x1xf32>
    %20 = vector.extract_strided_slice %6 {offsets = [2, 0], sizes = [1, 72], strides = [1, 1]} : vector<4x72xf32> to vector<1x72xf32>
    %21 = vector.broadcast %19 : vector<4x1xf32> to vector<4x72xf32>
    %22 = vector.broadcast %20 : vector<1x72xf32> to vector<4x72xf32>
    %23 = arith.mulf %21, %22 : vector<4x72xf32>
    %24 = arith.addf %18, %23 : vector<4x72xf32>
    %25 = vector.extract_strided_slice %5 {offsets = [0, 3], sizes = [4, 1], strides = [1, 1]} : vector<4x4xf32> to vector<4x1xf32>
    %26 = vector.extract_strided_slice %6 {offsets = [3, 0], sizes = [1, 72], strides = [1, 1]} : vector<4x72xf32> to vector<1x72xf32>
    %27 = vector.broadcast %25 : vector<4x1xf32> to vector<4x72xf32>
    %28 = vector.broadcast %26 : vector<1x72xf32> to vector<4x72xf32>
    %29 = arith.mulf %27, %28 : vector<4x72xf32>
    %30 = arith.addf %24, %29 : vector<4x72xf32>
    %c0_5 = arith.constant 0 : index
    %c0_6 = arith.constant 0 : index
    %c0_7 = arith.constant 0 : index
    %31 = vector.load %arg2[%c0_5, %c0_6, %c0_7] : memref<1x4x90xbf16, #tpu.memory_space<vmem>>, vector<1x4x72xbf16>
    %32 = vector.shape_cast %31 : vector<1x4x72xbf16> to vector<4x72xbf16>
    %c1 = arith.constant 1 : index
    %c0_8 = arith.constant 0 : index
    %c0_9 = arith.constant 0 : index
    %33 = vector.load %arg5[%c1, %c0_8, %c0_9] : memref<9x4x4xbf16, #tpu.memory_space<vmem>>, vector<1x4x4xbf16>
    %34 = vector.shape_cast %33 : vector<1x4x4xbf16> to vector<4x4xbf16>
    %35 = arith.extf %34 : vector<4x4xbf16> to vector<4x4xf32>
    %36 = arith.extf %32 : vector<4x72xbf16> to vector<4x72xf32>
    %37 = vector.extract_strided_slice %35 {offsets = [0, 0], sizes = [4, 1], strides = [1, 1]} : vector<4x4xf32> to vector<4x1xf32>
    %38 = vector.extract_strided_slice %36 {offsets = [0, 0], sizes = [1, 72], strides = [1, 1]} : vector<4x72xf32> to vector<1x72xf32>
    %39 = vector.broadcast %37 : vector<4x1xf32> to vector<4x72xf32>
    %40 = vector.broadcast %38 : vector<1x72xf32> to vector<4x72xf32>
    %41 = arith.mulf %39, %40 : vector<4x72xf32>
    %42 = arith.addf %30, %41 : vector<4x72xf32>
    %43 = vector.extract_strided_slice %35 {offsets = [0, 1], sizes = [4, 1], strides = [1, 1]} : vector<4x4xf32> to vector<4x1xf32>
    %44 = vector.extract_strided_slice %36 {offsets = [1, 0], sizes = [1, 72], strides = [1, 1]} : vector<4x72xf32> to vector<1x72xf32>
    %45 = vector.broadcast %43 : vector<4x1xf32> to vector<4x72xf32>
    %46 = vector.broadcast %44 : vector<1x72xf32> to vector<4x72xf32>
    %47 = arith.mulf %45, %46 : vector<4x72xf32>
    %48 = arith.addf %42, %47 : vector<4x72xf32>
    %49 = vector.extract_strided_slice %35 {offsets = [0, 2], sizes = [4, 1], strides = [1, 1]} : vector<4x4xf32> to vector<4x1xf32>
    %50 = vector.extract_strided_slice %36 {offsets = [2, 0], sizes = [1, 72], strides = [1, 1]} : vector<4x72xf32> to vector<1x72xf32>
    %51 = vector.broadcast %49 : vector<4x1xf32> to vector<4x72xf32>
    %52 = vector.broadcast %50 : vector<1x72xf32> to vector<4x72xf32>
    %53 = arith.mulf %51, %52 : vector<4x72xf32>
    %54 = arith.addf %48, %53 : vector<4x72xf32>
    %55 = vector.extract_strided_slice %35 {offsets = [0, 3], sizes = [4, 1], strides = [1, 1]} : vector<4x4xf32> to vector<4x1xf32>
    %56 = vector.extract_strided_slice %36 {offsets = [3, 0], sizes = [1, 72], strides = [1, 1]} : vector<4x72xf32> to vector<1x72xf32>
    %57 = vector.broadcast %55 : vector<4x1xf32> to vector<4x72xf32>
    %58 = vector.broadcast %56 : vector<1x72xf32> to vector<4x72xf32>
    %59 = arith.mulf %57, %58 : vector<4x72xf32>
    %60 = arith.addf %54, %59 : vector<4x72xf32>
    %c0_10 = arith.constant 0 : index
    %c0_11 = arith.constant 0 : index
    %c1_12 = arith.constant 1 : index
    %61 = vector.load %arg1[%c0_10, %c0_11, %c1_12] : memref<1x4x90xbf16, #tpu.memory_space<vmem>>, vector<1x4x72xbf16>
    %62 = vector.shape_cast %61 : vector<1x4x72xbf16> to vector<4x72xbf16>
    %c2 = arith.constant 2 : index
    %c0_13 = arith.constant 0 : index
    %c0_14 = arith.constant 0 : index
    %63 = vector.load %arg5[%c2, %c0_13, %c0_14] : memref<9x4x4xbf16, #tpu.memory_space<vmem>>, vector<1x4x4xbf16>
    %64 = vector.shape_cast %63 : vector<1x4x4xbf16> to vector<4x4xbf16>
    %65 = arith.extf %64 : vector<4x4xbf16> to vector<4x4xf32>
    %66 = arith.extf %62 : vector<4x72xbf16> to vector<4x72xf32>
    %67 = vector.extract_strided_slice %65 {offsets = [0, 0], sizes = [4, 1], strides = [1, 1]} : vector<4x4xf32> to vector<4x1xf32>
    %68 = vector.extract_strided_slice %66 {offsets = [0, 0], sizes = [1, 72], strides = [1, 1]} : vector<4x72xf32> to vector<1x72xf32>
    %69 = vector.broadcast %67 : vector<4x1xf32> to vector<4x72xf32>
    %70 = vector.broadcast %68 : vector<1x72xf32> to vector<4x72xf32>
    %71 = arith.mulf %69, %70 : vector<4x72xf32>
    %72 = arith.addf %60, %71 : vector<4x72xf32>
    %73 = vector.extract_strided_slice %65 {offsets = [0, 1], sizes = [4, 1], strides = [1, 1]} : vector<4x4xf32> to vector<4x1xf32>
    %74 = vector.extract_strided_slice %66 {offsets = [1, 0], sizes = [1, 72], strides = [1, 1]} : vector<4x72xf32> to vector<1x72xf32>
    %75 = vector.broadcast %73 : vector<4x1xf32> to vector<4x72xf32>
    %76 = vector.broadcast %74 : vector<1x72xf32> to vector<4x72xf32>
    %77 = arith.mulf %75, %76 : vector<4x72xf32>
    %78 = arith.addf %72, %77 : vector<4x72xf32>
    %79 = vector.extract_strided_slice %65 {offsets = [0, 2], sizes = [4, 1], strides = [1, 1]} : vector<4x4xf32> to vector<4x1xf32>
    %80 = vector.extract_strided_slice %66 {offsets = [2, 0], sizes = [1, 72], strides = [1, 1]} : vector<4x72xf32> to vector<1x72xf32>
    %81 = vector.broadcast %79 : vector<4x1xf32> to vector<4x72xf32>
    %82 = vector.broadcast %80 : vector<1x72xf32> to vector<4x72xf32>
    %83 = arith.mulf %81, %82 : vector<4x72xf32>
    %84 = arith.addf %78, %83 : vector<4x72xf32>
    %85 = vector.extract_strided_slice %65 {offsets = [0, 3], sizes = [4, 1], strides = [1, 1]} : vector<4x4xf32> to vector<4x1xf32>
    %86 = vector.extract_strided_slice %66 {offsets = [3, 0], sizes = [1, 72], strides = [1, 1]} : vector<4x72xf32> to vector<1x72xf32>
    %87 = vector.broadcast %85 : vector<4x1xf32> to vector<4x72xf32>
    %88 = vector.broadcast %86 : vector<1x72xf32> to vector<4x72xf32>
    %89 = arith.mulf %87, %88 : vector<4x72xf32>
    %90 = arith.addf %84, %89 : vector<4x72xf32>
    %c0_15 = arith.constant 0 : index
    %c0_16 = arith.constant 0 : index
    %c0_17 = arith.constant 0 : index
    %91 = vector.load %arg3[%c0_15, %c0_16, %c0_17] : memref<1x4x90xbf16, #tpu.memory_space<vmem>>, vector<1x4x72xbf16>
    %92 = vector.shape_cast %91 : vector<1x4x72xbf16> to vector<4x72xbf16>
    %c3 = arith.constant 3 : index
    %c0_18 = arith.constant 0 : index
    %c0_19 = arith.constant 0 : index
    %93 = vector.load %arg5[%c3, %c0_18, %c0_19] : memref<9x4x4xbf16, #tpu.memory_space<vmem>>, vector<1x4x4xbf16>
    %94 = vector.shape_cast %93 : vector<1x4x4xbf16> to vector<4x4xbf16>
    %95 = arith.extf %94 : vector<4x4xbf16> to vector<4x4xf32>
    %96 = arith.extf %92 : vector<4x72xbf16> to vector<4x72xf32>
    %97 = vector.extract_strided_slice %95 {offsets = [0, 0], sizes = [4, 1], strides = [1, 1]} : vector<4x4xf32> to vector<4x1xf32>
    %98 = vector.extract_strided_slice %96 {offsets = [0, 0], sizes = [1, 72], strides = [1, 1]} : vector<4x72xf32> to vector<1x72xf32>
    %99 = vector.broadcast %97 : vector<4x1xf32> to vector<4x72xf32>
    %100 = vector.broadcast %98 : vector<1x72xf32> to vector<4x72xf32>
    %101 = arith.mulf %99, %100 : vector<4x72xf32>
    %102 = arith.addf %90, %101 : vector<4x72xf32>
    %103 = vector.extract_strided_slice %95 {offsets = [0, 1], sizes = [4, 1], strides = [1, 1]} : vector<4x4xf32> to vector<4x1xf32>
    %104 = vector.extract_strided_slice %96 {offsets = [1, 0], sizes = [1, 72], strides = [1, 1]} : vector<4x72xf32> to vector<1x72xf32>
    %105 = vector.broadcast %103 : vector<4x1xf32> to vector<4x72xf32>
    %106 = vector.broadcast %104 : vector<1x72xf32> to vector<4x72xf32>
    %107 = arith.mulf %105, %106 : vector<4x72xf32>
    %108 = arith.addf %102, %107 : vector<4x72xf32>
    %109 = vector.extract_strided_slice %95 {offsets = [0, 2], sizes = [4, 1], strides = [1, 1]} : vector<4x4xf32> to vector<4x1xf32>
    %110 = vector.extract_strided_slice %96 {offsets = [2, 0], sizes = [1, 72], strides = [1, 1]} : vector<4x72xf32> to vector<1x72xf32>
    %111 = vector.broadcast %109 : vector<4x1xf32> to vector<4x72xf32>
    %112 = vector.broadcast %110 : vector<1x72xf32> to vector<4x72xf32>
    %113 = arith.mulf %111, %112 : vector<4x72xf32>
    %114 = arith.addf %108, %113 : vector<4x72xf32>
    %115 = vector.extract_strided_slice %95 {offsets = [0, 3], sizes = [4, 1], strides = [1, 1]} : vector<4x4xf32> to vector<4x1xf32>
    %116 = vector.extract_strided_slice %96 {offsets = [3, 0], sizes = [1, 72], strides = [1, 1]} : vector<4x72xf32> to vector<1x72xf32>
    %117 = vector.broadcast %115 : vector<4x1xf32> to vector<4x72xf32>
    %118 = vector.broadcast %116 : vector<1x72xf32> to vector<4x72xf32>
    %119 = arith.mulf %117, %118 : vector<4x72xf32>
    %120 = arith.addf %114, %119 : vector<4x72xf32>
    %c0_20 = arith.constant 0 : index
    %c0_21 = arith.constant 0 : index
    %c0_22 = arith.constant 0 : index
    %121 = vector.load %arg4[%c0_20, %c0_21, %c0_22] : memref<1x4x90xbf16, #tpu.memory_space<vmem>>, vector<1x4x72xbf16>
    %122 = vector.shape_cast %121 : vector<1x4x72xbf16> to vector<4x72xbf16>
    %c4 = arith.constant 4 : index
    %c0_23 = arith.constant 0 : index
    %c0_24 = arith.constant 0 : index
    %123 = vector.load %arg5[%c4, %c0_23, %c0_24] : memref<9x4x4xbf16, #tpu.memory_space<vmem>>, vector<1x4x4xbf16>
    %124 = vector.shape_cast %123 : vector<1x4x4xbf16> to vector<4x4xbf16>
    %125 = arith.extf %124 : vector<4x4xbf16> to vector<4x4xf32>
    %126 = arith.extf %122 : vector<4x72xbf16> to vector<4x72xf32>
    %127 = vector.extract_strided_slice %125 {offsets = [0, 0], sizes = [4, 1], strides = [1, 1]} : vector<4x4xf32> to vector<4x1xf32>
    %128 = vector.extract_strided_slice %126 {offsets = [0, 0], sizes = [1, 72], strides = [1, 1]} : vector<4x72xf32> to vector<1x72xf32>
    %129 = vector.broadcast %127 : vector<4x1xf32> to vector<4x72xf32>
    %130 = vector.broadcast %128 : vector<1x72xf32> to vector<4x72xf32>
    %131 = arith.mulf %129, %130 : vector<4x72xf32>
    %132 = arith.addf %120, %131 : vector<4x72xf32>
    %133 = vector.extract_strided_slice %125 {offsets = [0, 1], sizes = [4, 1], strides = [1, 1]} : vector<4x4xf32> to vector<4x1xf32>
    %134 = vector.extract_strided_slice %126 {offsets = [1, 0], sizes = [1, 72], strides = [1, 1]} : vector<4x72xf32> to vector<1x72xf32>
    %135 = vector.broadcast %133 : vector<4x1xf32> to vector<4x72xf32>
    %136 = vector.broadcast %134 : vector<1x72xf32> to vector<4x72xf32>
    %137 = arith.mulf %135, %136 : vector<4x72xf32>
    %138 = arith.addf %132, %137 : vector<4x72xf32>
    %139 = vector.extract_strided_slice %125 {offsets = [0, 2], sizes = [4, 1], strides = [1, 1]} : vector<4x4xf32> to vector<4x1xf32>
    %140 = vector.extract_strided_slice %126 {offsets = [2, 0], sizes = [1, 72], strides = [1, 1]} : vector<4x72xf32> to vector<1x72xf32>
    %141 = vector.broadcast %139 : vector<4x1xf32> to vector<4x72xf32>
    %142 = vector.broadcast %140 : vector<1x72xf32> to vector<4x72xf32>
    %143 = arith.mulf %141, %142 : vector<4x72xf32>
    %144 = arith.addf %138, %143 : vector<4x72xf32>
    %145 = vector.extract_strided_slice %125 {offsets = [0, 3], sizes = [4, 1], strides = [1, 1]} : vector<4x4xf32> to vector<4x1xf32>
    %146 = vector.extract_strided_slice %126 {offsets = [3, 0], sizes = [1, 72], strides = [1, 1]} : vector<4x72xf32> to vector<1x72xf32>
    %147 = vector.broadcast %145 : vector<4x1xf32> to vector<4x72xf32>
    %148 = vector.broadcast %146 : vector<1x72xf32> to vector<4x72xf32>
    %149 = arith.mulf %147, %148 : vector<4x72xf32>
    %150 = arith.addf %144, %149 : vector<4x72xf32>
    %c0_25 = arith.constant 0 : index
    %c0_26 = arith.constant 0 : index
    %c1_27 = arith.constant 1 : index
    %151 = vector.load %arg3[%c0_25, %c0_26, %c1_27] : memref<1x4x90xbf16, #tpu.memory_space<vmem>>, vector<1x4x72xbf16>
    %152 = vector.shape_cast %151 : vector<1x4x72xbf16> to vector<4x72xbf16>
    %c5 = arith.constant 5 : index
    %c0_28 = arith.constant 0 : index
    %c0_29 = arith.constant 0 : index
    %153 = vector.load %arg5[%c5, %c0_28, %c0_29] : memref<9x4x4xbf16, #tpu.memory_space<vmem>>, vector<1x4x4xbf16>
    %154 = vector.shape_cast %153 : vector<1x4x4xbf16> to vector<4x4xbf16>
    %155 = arith.extf %154 : vector<4x4xbf16> to vector<4x4xf32>
    %156 = arith.extf %152 : vector<4x72xbf16> to vector<4x72xf32>
    %157 = vector.extract_strided_slice %155 {offsets = [0, 0], sizes = [4, 1], strides = [1, 1]} : vector<4x4xf32> to vector<4x1xf32>
    %158 = vector.extract_strided_slice %156 {offsets = [0, 0], sizes = [1, 72], strides = [1, 1]} : vector<4x72xf32> to vector<1x72xf32>
    %159 = vector.broadcast %157 : vector<4x1xf32> to vector<4x72xf32>
    %160 = vector.broadcast %158 : vector<1x72xf32> to vector<4x72xf32>
    %161 = arith.mulf %159, %160 : vector<4x72xf32>
    %162 = arith.addf %150, %161 : vector<4x72xf32>
    %163 = vector.extract_strided_slice %155 {offsets = [0, 1], sizes = [4, 1], strides = [1, 1]} : vector<4x4xf32> to vector<4x1xf32>
    %164 = vector.extract_strided_slice %156 {offsets = [1, 0], sizes = [1, 72], strides = [1, 1]} : vector<4x72xf32> to vector<1x72xf32>
    %165 = vector.broadcast %163 : vector<4x1xf32> to vector<4x72xf32>
    %166 = vector.broadcast %164 : vector<1x72xf32> to vector<4x72xf32>
    %167 = arith.mulf %165, %166 : vector<4x72xf32>
    %168 = arith.addf %162, %167 : vector<4x72xf32>
    %169 = vector.extract_strided_slice %155 {offsets = [0, 2], sizes = [4, 1], strides = [1, 1]} : vector<4x4xf32> to vector<4x1xf32>
    %170 = vector.extract_strided_slice %156 {offsets = [2, 0], sizes = [1, 72], strides = [1, 1]} : vector<4x72xf32> to vector<1x72xf32>
    %171 = vector.broadcast %169 : vector<4x1xf32> to vector<4x72xf32>
    %172 = vector.broadcast %170 : vector<1x72xf32> to vector<4x72xf32>
    %173 = arith.mulf %171, %172 : vector<4x72xf32>
    %174 = arith.addf %168, %173 : vector<4x72xf32>
    %175 = vector.extract_strided_slice %155 {offsets = [0, 3], sizes = [4, 1], strides = [1, 1]} : vector<4x4xf32> to vector<4x1xf32>
    %176 = vector.extract_strided_slice %156 {offsets = [3, 0], sizes = [1, 72], strides = [1, 1]} : vector<4x72xf32> to vector<1x72xf32>
    %177 = vector.broadcast %175 : vector<4x1xf32> to vector<4x72xf32>
    %178 = vector.broadcast %176 : vector<1x72xf32> to vector<4x72xf32>
    %179 = arith.mulf %177, %178 : vector<4x72xf32>
    %180 = arith.addf %174, %179 : vector<4x72xf32>
    %c0_30 = arith.constant 0 : index
    %c0_31 = arith.constant 0 : index
    %c9 = arith.constant 9 : index
    %181 = vector.load %arg1[%c0_30, %c0_31, %c9] : memref<1x4x90xbf16, #tpu.memory_space<vmem>>, vector<1x4x72xbf16>
    %182 = vector.shape_cast %181 : vector<1x4x72xbf16> to vector<4x72xbf16>
    %c6 = arith.constant 6 : index
    %c0_32 = arith.constant 0 : index
    %c0_33 = arith.constant 0 : index
    %183 = vector.load %arg5[%c6, %c0_32, %c0_33] : memref<9x4x4xbf16, #tpu.memory_space<vmem>>, vector<1x4x4xbf16>
    %184 = vector.shape_cast %183 : vector<1x4x4xbf16> to vector<4x4xbf16>
    %185 = arith.extf %184 : vector<4x4xbf16> to vector<4x4xf32>
    %186 = arith.extf %182 : vector<4x72xbf16> to vector<4x72xf32>
    %187 = vector.extract_strided_slice %185 {offsets = [0, 0], sizes = [4, 1], strides = [1, 1]} : vector<4x4xf32> to vector<4x1xf32>
    %188 = vector.extract_strided_slice %186 {offsets = [0, 0], sizes = [1, 72], strides = [1, 1]} : vector<4x72xf32> to vector<1x72xf32>
    %189 = vector.broadcast %187 : vector<4x1xf32> to vector<4x72xf32>
    %190 = vector.broadcast %188 : vector<1x72xf32> to vector<4x72xf32>
    %191 = arith.mulf %189, %190 : vector<4x72xf32>
    %192 = arith.addf %180, %191 : vector<4x72xf32>
    %193 = vector.extract_strided_slice %185 {offsets = [0, 1], sizes = [4, 1], strides = [1, 1]} : vector<4x4xf32> to vector<4x1xf32>
    %194 = vector.extract_strided_slice %186 {offsets = [1, 0], sizes = [1, 72], strides = [1, 1]} : vector<4x72xf32> to vector<1x72xf32>
    %195 = vector.broadcast %193 : vector<4x1xf32> to vector<4x72xf32>
    %196 = vector.broadcast %194 : vector<1x72xf32> to vector<4x72xf32>
    %197 = arith.mulf %195, %196 : vector<4x72xf32>
    %198 = arith.addf %192, %197 : vector<4x72xf32>
    %199 = vector.extract_strided_slice %185 {offsets = [0, 2], sizes = [4, 1], strides = [1, 1]} : vector<4x4xf32> to vector<4x1xf32>
    %200 = vector.extract_strided_slice %186 {offsets = [2, 0], sizes = [1, 72], strides = [1, 1]} : vector<4x72xf32> to vector<1x72xf32>
    %201 = vector.broadcast %199 : vector<4x1xf32> to vector<4x72xf32>
    %202 = vector.broadcast %200 : vector<1x72xf32> to vector<4x72xf32>
    %203 = arith.mulf %201, %202 : vector<4x72xf32>
    %204 = arith.addf %198, %203 : vector<4x72xf32>
    %205 = vector.extract_strided_slice %185 {offsets = [0, 3], sizes = [4, 1], strides = [1, 1]} : vector<4x4xf32> to vector<4x1xf32>
    %206 = vector.extract_strided_slice %186 {offsets = [3, 0], sizes = [1, 72], strides = [1, 1]} : vector<4x72xf32> to vector<1x72xf32>
    %207 = vector.broadcast %205 : vector<4x1xf32> to vector<4x72xf32>
    %208 = vector.broadcast %206 : vector<1x72xf32> to vector<4x72xf32>
    %209 = arith.mulf %207, %208 : vector<4x72xf32>
    %210 = arith.addf %204, %209 : vector<4x72xf32>
    %c0_34 = arith.constant 0 : index
    %c0_35 = arith.constant 0 : index
    %c9_36 = arith.constant 9 : index
    %211 = vector.load %arg2[%c0_34, %c0_35, %c9_36] : memref<1x4x90xbf16, #tpu.memory_space<vmem>>, vector<1x4x72xbf16>
    %212 = vector.shape_cast %211 : vector<1x4x72xbf16> to vector<4x72xbf16>
    %c7 = arith.constant 7 : index
    %c0_37 = arith.constant 0 : index
    %c0_38 = arith.constant 0 : index
    %213 = vector.load %arg5[%c7, %c0_37, %c0_38] : memref<9x4x4xbf16, #tpu.memory_space<vmem>>, vector<1x4x4xbf16>
    %214 = vector.shape_cast %213 : vector<1x4x4xbf16> to vector<4x4xbf16>
    %215 = arith.extf %214 : vector<4x4xbf16> to vector<4x4xf32>
    %216 = arith.extf %212 : vector<4x72xbf16> to vector<4x72xf32>
    %217 = vector.extract_strided_slice %215 {offsets = [0, 0], sizes = [4, 1], strides = [1, 1]} : vector<4x4xf32> to vector<4x1xf32>
    %218 = vector.extract_strided_slice %216 {offsets = [0, 0], sizes = [1, 72], strides = [1, 1]} : vector<4x72xf32> to vector<1x72xf32>
    %219 = vector.broadcast %217 : vector<4x1xf32> to vector<4x72xf32>
    %220 = vector.broadcast %218 : vector<1x72xf32> to vector<4x72xf32>
    %221 = arith.mulf %219, %220 : vector<4x72xf32>
    %222 = arith.addf %210, %221 : vector<4x72xf32>
    %223 = vector.extract_strided_slice %215 {offsets = [0, 1], sizes = [4, 1], strides = [1, 1]} : vector<4x4xf32> to vector<4x1xf32>
    %224 = vector.extract_strided_slice %216 {offsets = [1, 0], sizes = [1, 72], strides = [1, 1]} : vector<4x72xf32> to vector<1x72xf32>
    %225 = vector.broadcast %223 : vector<4x1xf32> to vector<4x72xf32>
    %226 = vector.broadcast %224 : vector<1x72xf32> to vector<4x72xf32>
    %227 = arith.mulf %225, %226 : vector<4x72xf32>
    %228 = arith.addf %222, %227 : vector<4x72xf32>
    %229 = vector.extract_strided_slice %215 {offsets = [0, 2], sizes = [4, 1], strides = [1, 1]} : vector<4x4xf32> to vector<4x1xf32>
    %230 = vector.extract_strided_slice %216 {offsets = [2, 0], sizes = [1, 72], strides = [1, 1]} : vector<4x72xf32> to vector<1x72xf32>
    %231 = vector.broadcast %229 : vector<4x1xf32> to vector<4x72xf32>
    %232 = vector.broadcast %230 : vector<1x72xf32> to vector<4x72xf32>
    %233 = arith.mulf %231, %232 : vector<4x72xf32>
    %234 = arith.addf %228, %233 : vector<4x72xf32>
    %235 = vector.extract_strided_slice %215 {offsets = [0, 3], sizes = [4, 1], strides = [1, 1]} : vector<4x4xf32> to vector<4x1xf32>
    %236 = vector.extract_strided_slice %216 {offsets = [3, 0], sizes = [1, 72], strides = [1, 1]} : vector<4x72xf32> to vector<1x72xf32>
    %237 = vector.broadcast %235 : vector<4x1xf32> to vector<4x72xf32>
    %238 = vector.broadcast %236 : vector<1x72xf32> to vector<4x72xf32>
    %239 = arith.mulf %237, %238 : vector<4x72xf32>
    %240 = arith.addf %234, %239 : vector<4x72xf32>
    %c0_39 = arith.constant 0 : index
    %c0_40 = arith.constant 0 : index
    %c10 = arith.constant 10 : index
    %241 = vector.load %arg1[%c0_39, %c0_40, %c10] : memref<1x4x90xbf16, #tpu.memory_space<vmem>>, vector<1x4x72xbf16>
    %242 = vector.shape_cast %241 : vector<1x4x72xbf16> to vector<4x72xbf16>
    %c8 = arith.constant 8 : index
    %c0_41 = arith.constant 0 : index
    %c0_42 = arith.constant 0 : index
    %243 = vector.load %arg5[%c8, %c0_41, %c0_42] : memref<9x4x4xbf16, #tpu.memory_space<vmem>>, vector<1x4x4xbf16>
    %244 = vector.shape_cast %243 : vector<1x4x4xbf16> to vector<4x4xbf16>
    %245 = arith.extf %244 : vector<4x4xbf16> to vector<4x4xf32>
    %246 = arith.extf %242 : vector<4x72xbf16> to vector<4x72xf32>
    %247 = vector.extract_strided_slice %245 {offsets = [0, 0], sizes = [4, 1], strides = [1, 1]} : vector<4x4xf32> to vector<4x1xf32>
    %248 = vector.extract_strided_slice %246 {offsets = [0, 0], sizes = [1, 72], strides = [1, 1]} : vector<4x72xf32> to vector<1x72xf32>
    %249 = vector.broadcast %247 : vector<4x1xf32> to vector<4x72xf32>
    %250 = vector.broadcast %248 : vector<1x72xf32> to vector<4x72xf32>
    %251 = arith.mulf %249, %250 : vector<4x72xf32>
    %252 = arith.addf %240, %251 : vector<4x72xf32>
    %253 = vector.extract_strided_slice %245 {offsets = [0, 1], sizes = [4, 1], strides = [1, 1]} : vector<4x4xf32> to vector<4x1xf32>
    %254 = vector.extract_strided_slice %246 {offsets = [1, 0], sizes = [1, 72], strides = [1, 1]} : vector<4x72xf32> to vector<1x72xf32>
    %255 = vector.broadcast %253 : vector<4x1xf32> to vector<4x72xf32>
    %256 = vector.broadcast %254 : vector<1x72xf32> to vector<4x72xf32>
    %257 = arith.mulf %255, %256 : vector<4x72xf32>
    %258 = arith.addf %252, %257 : vector<4x72xf32>
    %259 = vector.extract_strided_slice %245 {offsets = [0, 2], sizes = [4, 1], strides = [1, 1]} : vector<4x4xf32> to vector<4x1xf32>
    %260 = vector.extract_strided_slice %246 {offsets = [2, 0], sizes = [1, 72], strides = [1, 1]} : vector<4x72xf32> to vector<1x72xf32>
    %261 = vector.broadcast %259 : vector<4x1xf32> to vector<4x72xf32>
    %262 = vector.broadcast %260 : vector<1x72xf32> to vector<4x72xf32>
    %263 = arith.mulf %261, %262 : vector<4x72xf32>
    %264 = arith.addf %258, %263 : vector<4x72xf32>
    %265 = vector.extract_strided_slice %245 {offsets = [0, 3], sizes = [4, 1], strides = [1, 1]} : vector<4x4xf32> to vector<4x1xf32>
    %266 = vector.extract_strided_slice %246 {offsets = [3, 0], sizes = [1, 72], strides = [1, 1]} : vector<4x72xf32> to vector<1x72xf32>
    %267 = vector.broadcast %265 : vector<4x1xf32> to vector<4x72xf32>
    %268 = vector.broadcast %266 : vector<1x72xf32> to vector<4x72xf32>
    %269 = arith.mulf %267, %268 : vector<4x72xf32>
    %270 = arith.addf %264, %269 : vector<4x72xf32>
    %c0_43 = arith.constant 0 : index
    %c0_44 = arith.constant 0 : index
    %271 = vector.load %arg6[%c0_43, %c0_44] : memref<4x1xf32, #tpu.memory_space<vmem>>, vector<4x1xf32>
    %272 = vector.broadcast %271 : vector<4x1xf32> to vector<4x72xf32>
    %273 = arith.addf %270, %272 : vector<4x72xf32>
    %cst_45 = arith.constant 0.000000e+00 : f32
    %274 = vector.broadcast %cst_45 : f32 to vector<4x72xf32>
    %275 = arith.cmpf oge, %273, %274 : vector<4x72xf32>
    %cst_46 = arith.constant 0.00999999977 : f32
    %276 = vector.broadcast %cst_46 : f32 to vector<4x72xf32>
    %277 = arith.mulf %276, %273 : vector<4x72xf32>
    %278 = arith.select %275, %273, %277 : vector<4x72xi1>, vector<4x72xf32>
    %c0_47 = arith.constant 0 : index
    %c0_48 = arith.constant 0 : index
    %c0_49 = arith.constant 0 : index
    %279 = vector.load %arg7[%c0_47, %c0_48, %c0_49] : memref<1x4x72xf32, #tpu.memory_space<vmem>>, vector<1x4x72xf32>
    %280 = vector.shape_cast %279 : vector<1x4x72xf32> to vector<4x72xf32>
    %281 = vector.shape_cast %278 : vector<4x72xf32> to vector<1x4x72xf32>
    tpu.vector_store %arg7[%c0_47, %c0_48, %c0_49], %281 {strides = array<i32>} : memref<1x4x72xf32, #tpu.memory_space<vmem>>, vector<1x4x72xf32>,
    return
  }
  func.func @transform_0(%arg0: i32) -> (i32, i32, i32) {
    %c0_i32 = arith.constant 0 : i32
    %c0_i32_0 = arith.constant 0 : i32
    %c0_i32_1 = arith.constant 0 : i32
    return %arg0, %c0_i32, %c0_i32_0 : i32, i32, i32
  }
  func.func @transform_1(%arg0: i32) -> (i32, i32, i32) {
    %c0_i32 = arith.constant 0 : i32
    %c0_i32_0 = arith.constant 0 : i32
    %c0_i32_1 = arith.constant 0 : i32
    return %arg0, %c0_i32, %c0_i32_0 : i32, i32, i32
  }
  func.func @transform_2(%arg0: i32) -> (i32, i32, i32) {
    %c0_i32 = arith.constant 0 : i32
    %c0_i32_0 = arith.constant 0 : i32
    %c0_i32_1 = arith.constant 0 : i32
    return %arg0, %c0_i32, %c0_i32_0 : i32, i32, i32
  }
  func.func @transform_3(%arg0: i32) -> (i32, i32, i32) {
    %c0_i32 = arith.constant 0 : i32
    %c0_i32_0 = arith.constant 0 : i32
    %c0_i32_1 = arith.constant 0 : i32
    return %arg0, %c0_i32, %c0_i32_0 : i32, i32, i32
  }
  func.func @transform_4(%arg0: i32) -> (i32, i32, i32) {
    %c0_i32 = arith.constant 0 : i32
    %c0_i32_0 = arith.constant 0 : i32
    %c0_i32_1 = arith.constant 0 : i32
    %c0_i32_2 = arith.constant 0 : i32
    return %c0_i32, %c0_i32_0, %c0_i32_1 : i32, i32, i32
  }
  func.func @transform_5(%arg0: i32) -> (i32, i32) {
    %c0_i32 = arith.constant 0 : i32
    %c0_i32_0 = arith.constant 0 : i32
    %c0_i32_1 = arith.constant 0 : i32
    return %c0_i32, %c0_i32_0 : i32, i32
  }
  func.func @transform_6(%arg0: i32) -> (i32, i32, i32) {
    %c0_i32 = arith.constant 0 : i32
    %c0_i32_0 = arith.constant 0 : i32
    %c0_i32_1 = arith.constant 0 : i32
    return %arg0, %c0_i32, %c0_i32_0 : i32, i32, i32
  }
}

</mosaic_0001>

<bundles_post_ra>
// kernel: downsampling_forward.1
= control target key start
LH: loop header
LB: loop body
LE: loop exit
PB: predicated region body
PF: predicated region fallthrough
CT: control target
= control target key end

     0   :  { %s1127_s21 = smov 0   ;;  %s1344_s0 = inlined_call_operand.vmem [shape: bf16[2,4,90], index: 0, kind: input, shape index: {}]   ;;  %s1345_s1 = inlined_call_operand.vmem [shape: bf16[2,4,90], index: 1, kind: input, shape index: {}]   ;;  %s1346_s2 = inlined_call_operand.vmem [shape: bf16[2,4,90], index: 2, kind: input, shape index: {}]   ;;  %s1347_s3 = inlined_call_operand.vmem [shape: bf16[2,4,90], index: 3, kind: input, shape index: {}]   ;;  %s1348_s4 = inlined_call_operand.vmem [shape: bf16[9,4,4], index: 4, kind: input, shape index: {}]   ;;  %s1349_s5 = inlined_call_operand.vmem [shape: f32[4,1], index: 5, kind: input, shape index: {}]   ;;  %s1350_s6 = inlined_call_operand.vmem [shape: f32[2,4,72], index: 6, kind: output, shape index: {}]  }
   0x1 LB: > { %s890_s22 = sadd.s32 4294967295, %s1082_s21   ;;  %p894_p0 = scmp.ge.s32.totalorder %s1082_s21, 1  ;;  %s1082_s21 = sphi %s1127_s21, %s16_s21  }
   0x2   : > { %p238_p1 = scmp.lt.s32.totalorder %s1082_s21, 3 }
   0x4   : > { %p239_p2 = pnand %p894_p0, %p238_p1 }
   0x5   : > { %p278_p3 = scmp.lt.s32.totalorder (!%p239_p2), %s890_s22, 1  ;;  %s1088_s11 = smov (!%p239_p2), 127  }
   0x6   : > { %242 = sbr.rel (%p239_p2) target bundleno = 225 (0xe1), region = 44  ;;  %s1089_s28 = smov (!%p239_p2), 119  }
   0x7   : > { %s1090_s8 = smov (!%p239_p2), 118  }
   0xb   : > { %v299_v0 = vld [vmem:[%s1348_s4] sm:$0x3]  ;;  %v900_v1 = vld [vmem:[%s1348_s4 + $0x2] sm:$0x3]  ;;  %v1084_v2 = vmov 2   ;;  %v1085_v3 = vmov 0  }
   0xc   : > { %938 = vset.pattern.permute.xlu1 %v1084_v2  ;;  %926 = vset.pattern.permute.xlu0 %v1085_v3  ;;  %v300_v4 = vunpack.c.l.bf16 %v299_v0  ;;  %v350_v5 = vunpack.c.l.bf16 %v900_v1  ;;  %v901_v6 = vld [vmem:[%s1348_s4 + $0x4] sm:$0x3]  ;;  %v902_v7 = vld [vmem:[%s1348_s4 + $0x6] sm:$0x3]  ;;  %s1352_s22 = smov (!%p278_p3, %s890_s22), 1  ;;  %v1086_v16 = vmov 3  }
   0xd   : > { %950 = vset.pattern.permute.xlu2 %v1085_v3  ;;  %v399_v8 = vunpack.c.l.bf16 %v901_v6  ;;  %v460_v9 = vunpack.c.l.bf16 %v902_v7  ;;  %s1153_s7 = sshll.u32 %s1352_s22, 1  ;;  %v1087_v17 = vmov 1   ;;  %v903_v22 = vld [vmem:[%s1348_s4 + $0x8] sm:$0x3]  ;;  %v904_v23 = vld [vmem:[%s1348_s4 + $0xa] sm:$0x3] }
   0xe   : > { %v939_v10 = vpack.i.bf16 %v350_v5, %v300_v4  ;;  %s281_s10 = scalar_lea.vmem %s1344_s0, %s1153_s7  ;;  %s289_s18 = scalar_lea.vmem %s1346_s2, %s1153_s7  ;;  %v510_v24 = vunpack.c.l.bf16 %v903_v22  ;;  %v559_v25 = vunpack.c.l.bf16 %v904_v23  ;;  %v905_v34 = vld [vmem:[%s1348_s4 + $0xc] sm:$0x3]  ;;  %v906_v35 = vld [vmem:[%s1348_s4 + $0xe] sm:$0x3]  ;;  %v907_v47 = vld [vmem:[%s1348_s4 + $0x10] sm:$0x3] }
   0xf   : > { %v951_v11 = vpack.i.bf16 %v460_v9, %v399_v8  ;;  %v298_v12 = vld [vmem:[%s281_s10] sm:$0x3]  ;;  %v619_v36 = vunpack.c.l.bf16 %v905_v34  ;;  %v675_v37 = vunpack.c.l.bf16 %v906_v35  ;;  %s285_s27 = scalar_lea.vmem %s1345_s1, %s1153_s7  ;;  %v735_v49 = vunpack.c.l.bf16 %v907_v47  ;;  %s293_s13 = scalar_lea.vmem %s1347_s3, %s1153_s7 }
  0x10   : > { %940 = vperm.xlu1 %938, %v939_v10   ;;  %928 = vperm.xlu0 %926, %v939_v10   ;;  %v1159_v13 = vunpack.c.l.bf16 %v298_v12  ;;  %v457_v26 = vld [vmem:[%s289_s18] sm:$0x3]  ;;  %v990_v27 = vpack.i.bf16 %v559_v25, %v510_v24  ;;  %v1091_v55 = vmov 839922192   ;;  %s899_s7 = sshll.u32 %s1352_s22, 2  ;;  %vm799_vm0 = vcmask 584704  }
  0x11   : > { %952 = vperm.xlu2 %950, %v951_v11   ;;  %v1193_v28 = vunpack.c.l.bf16 %v457_v26  ;;  %v1018_v39 = vpack.i.bf16 %v675_v37, %v619_v36  ;;  %v347_v40 = vld [vmem:[%s285_s27] sm:$0x3]  ;;  %v308_v56 = vunpack.c.l.s4 %v1091_v55  ;;  %s297_s16 = scalar_lea.vmem %s1350_s6, %s899_s7 }
  0x12   : > { %v311_v14 = vperm.slane %v1159_v13, 0  ;;  %v322_v15 = vperm.slane %v1159_v13, 1  ;;  %v333_v19 = vperm.slane %v1159_v13, 2  ;;  %v344_v20 = vperm.slane %v1159_v13, 3  ;;  %v789_v50 = vld [vmem:[%s1349_s5] sm:$0xf] }
  0x13   : > { %v471_v29 = vperm.slane %v1193_v28, 0  ;;  %v482_v30 = vperm.slane %v1193_v28, 1  ;;  %v493_v32 = vperm.slane %v1193_v28, 2  ;;  %v504_v33 = vperm.slane %v1193_v28, 3 }
  0x14   : > { %v1168_v18 = vpack.i.bf16 %v322_v15, %v311_v14  ;;  %v1179_v21 = vpack.i.bf16 %v344_v20, %v333_v19  ;;  %v1225_v41 = vunpack.c.l.bf16 %v347_v40  ;;  %v1253_v58 = vunpack.c.0.s8 %v308_v56 }
  0x15   : > { %v1007_v31 = vpack.i.bf16 %v482_v30, %v471_v29  ;;  %v1012_v38 = vpack.i.bf16 %v504_v33, %v493_v32 }
  0x16   : > { %v383_v42 = vperm.slane %v1225_v41, 2  ;;  %v394_v43 = vperm.slane %v1225_v41, 3  ;;  %v361_v45 = vperm.slane %v1225_v41, 0  ;;  %v372_v46 = vperm.slane %v1225_v41, 1 }
  0x18   : > { %944 = vset.pattern.permute.xlu1 %v1086_v16  ;;  %932 = vset.pattern.permute.xlu0 %v1087_v17  ;;  %v1056_v44 = vpack.i.bf16 %v394_v43, %v383_v42  ;;  %v1051_v48 = vpack.i.bf16 %v372_v46, %v361_v45 }
  0x19   : > { %946 = vperm.xlu1 %944, %v939_v10   ;;  %934 = vperm.xlu0 %932, %v939_v10  }
  0x1a   : > { %963 = vrot.lane.b32.xlu2 %v1168_v18, %s1088_s11 }
  0x1b   : > { %967 = vset.pattern.permute.xlu2 %v1084_v2 }
  0x21   : > { %956 = vset.pattern.permute.xlu1 %v1087_v17  ;;  %974 = vrot.lane.b32.xlu0 %v1179_v21, %s1088_s11 }
  0x22   : > { %958 = vperm.xlu1 %956, %v951_v11   ;;  %969 = vperm.xlu2 %967, %v951_v11  }
  0x29   : > { %991 = vperm.xlu0 %932, %v990_v27  }
  0x2a   : > { %978 = vset.pattern.permute.xlu1 %v1086_v16  ;;  %984 = vset.pattern.permute.xlu2 %v1085_v3 }
  0x2b   : > { %980 = vperm.xlu1 %978, %v951_v11   ;;  %986 = vperm.xlu2 %984, %v990_v27  }
  0x31   : > { %1008 = vrot.lane.b32.xlu0 %v1007_v31, %s1088_s11 }
  0x33   : > { %995 = vset.pattern.permute.xlu1 %v1084_v2  ;;  %1001 = vset.pattern.permute.xlu2 %v1086_v16 }
  0x34   : > { %997 = vperm.xlu1 %995, %v990_v27   ;;  %1003 = vperm.xlu2 %1001, %v990_v27  }
  0x39   : > { %1024 = vrot.lane.b32.xlu0 %v1168_v18, %s1089_s28 }
  0x3c   : > { %1013 = vrot.lane.b32.xlu1 %v1012_v38, %s1088_s11  ;;  %1017 = vset.pattern.permute.xlu2 %v1085_v3 }
  0x3d   : > { %1028 = vset.pattern.permute.xlu1 %v1087_v17  ;;  %1019 = vperm.xlu2 %1017, %v1018_v39  }
  0x41   : > { %1041 = vrot.lane.b32.xlu0 %v1179_v21, %s1089_s28 }
  0x44   : > { %1030 = vperm.xlu1 %1028, %v1018_v39  }
  0x45   : > { %1034 = vset.pattern.permute.xlu2 %v1084_v2 }
  0x46   : > { %1036 = vperm.xlu2 %1034, %v1018_v39  }
  0x49   : > { %1057 = vrot.lane.b32.xlu0 %v1056_v44, %s1089_s28 }
  0x4c   : > { %1045 = vset.pattern.permute.xlu1 %v1086_v16 }
  0x4d   : > { %1047 = vperm.xlu1 %1045, %v1018_v39  }
  0x4e   : > { %1052 = vrot.lane.b32.xlu2 %v1051_v48, %s1089_s28 }
  0x51   : > { %751 = vperm.xlu0 %932, %v735_v49  }
  0x55   : > { %1061 = vset.pattern.permute.xlu1 %v1085_v3 }
  0x56   : > { %738 = vperm.xlu1 %1061, %v735_v49   ;;  %1063 = vrot.lane.b32.xlu2 %v1168_v18, %s1090_s8 }
  0x59   : > { %1073 = vset.pattern.permute.xlu0 %v1086_v16 }
  0x5a   : > { %777 = vperm.xlu0 %1073, %v735_v49  }
  0x5e   : > { %1067 = vset.pattern.permute.xlu1 %v1084_v2  ;;  %1069 = vrot.lane.b32.xlu2 %v1179_v21, %s1090_s8 }
  0x5f   : > { %764 = vperm.xlu1 %1067, %v735_v49  }
  0x62   : > { %1075 = vset.pattern.permute.xlu0 %v1085_v3 }
  0x67   : > { %1074 = vset.pattern.permute.xlu1 %v1085_v3 }
  0x68   : > { %792 = vperm.xlu1 %1074, %v789_v50  }
  0x6b   : > { %v1251_v51 = vpop.permute.xlu2 %952 }
  0x6c   : > { %v954_v23 = vunpack.i.l.bf16 %v1251_v51 }
  0x6e   : > { %v408_v13 = vperm.slane %v954_v23, %v1253_v58 }
  0x74   : > { %v964_v52 = vpop.permute.xlu2 %963 }
  0x75   : > { %v965_v35 = vunpack.i.l.bf16 %v964_v52 }
  0x77   : > { %v413_v48 = vmul.f32 %v965_v35, %v408_v13 }
  0x7c   : > { %v1255_v60 = vpop.permute.xlu2 %969 }
  0x7d   : > { %v971_v37 = vunpack.i.l.bf16 %v1255_v60 }
  0x82   : > { %v941_v53 = vpop.permute.xlu1 %940  ;;  %v929_v54 = vpop.permute.xlu0 %928 }
  0x83   : > { %v930_v57 = vunpack.i.l.bf16 %v929_v54  ;;  %v942_v59 = vunpack.i.l.bf16 %v941_v53  ;;  %v931_v3 = vunpack.i.h.bf16 %v929_v54  ;;  %v943_v9 = vunpack.i.h.bf16 %v941_v53 }
  0x85   : > { %v310_v63 = vperm.slane %v930_v57, %v1253_v58  ;;  %v332_v2 = vperm.slane %v942_v59, %v1253_v58  ;;  %v360_v11 = vperm.slane %v931_v3, %v1253_v58  ;;  %v1272_v24 = vpop.permute.xlu2 %986 }
  0x87   : > { %v312_v5 = vmul.f32 %v311_v14, %v310_v63  ;;  %v334_v10 = vmul.f32 %v333_v19, %v332_v2  ;;  %v362_v25 = vmul.f32 %v361_v45, %v360_v11  ;;  %v955_v45 = vunpack.i.h.bf16 %v1251_v51  ;;  %v507_v63 = vld [vmem:[%s293_s13] sm:$0x3] }
  0x8b   : > { %v947_v61 = vpop.permute.xlu1 %946  ;;  %v935_v62 = vpop.permute.xlu0 %934 }
  0x8c   : > { %v948_v0 = vunpack.i.l.bf16 %v947_v61  ;;  %v936_v1 = vunpack.i.l.bf16 %v935_v62  ;;  %v937_v7 = vunpack.i.h.bf16 %v935_v62  ;;  %v949_v17 = vunpack.i.h.bf16 %v947_v61 }
  0x8e   : > { %v321_v4 = vperm.slane %v936_v1, %v1253_v58  ;;  %v343_v6 = vperm.slane %v948_v0, %v1253_v58  ;;  %v371_v14 = vperm.slane %v937_v7, %v1253_v58  ;;  %v393_v26 = vperm.slane %v949_v17, %v1253_v58  ;;  %v1287_v53 = vpop.permute.xlu2 %1003 }
  0x90   : > { %v323_v8 = vmul.f32 %v322_v15, %v321_v4  ;;  %v345_v18 = vmul.f32 %v344_v20, %v343_v6  ;;  %v382_v15 = vperm.slane %v943_v9, %v1253_v58  ;;  %v373_v31 = vmul.f32 %v372_v46, %v371_v14 }
  0x91   : > { %v395_v39 = vmul.f32 %v394_v43, %v393_v26  ;;  %v966_v46 = vunpack.i.h.bf16 %v964_v52  ;;  %v470_v43 = vperm.slane %v955_v45, %v1253_v58  ;;  %v972_v52 = vunpack.i.h.bf16 %v1255_v60 }
  0x92   : > { %v324_v12 = vadd.f32 %v323_v8, %v312_v5  ;;  %v384_v20 = vmul.f32 %v383_v42, %v382_v15  ;;  %v436_v42 = vperm.slane %v971_v37, %v1253_v58  ;;  %v988_v6 = vunpack.i.l.bf16 %v1272_v24 }
  0x93   : > { %v975_v16 = vpop.permute.xlu0 %974  ;;  %v472_v4 = vmul.f32 %v471_v29, %v470_v43  ;;  %v492_v5 = vperm.slane %v972_v52, %v1253_v58  ;;  %v511_v60 = vunpack.c.l.bf16 %v507_v63 }
  0x94   : > { %v335_v21 = vadd.f32 %v334_v10, %v324_v12  ;;  %v959_v22 = vpop.permute.xlu1 %958  ;;  %v976_v49 = vunpack.i.l.bf16 %v975_v16  ;;  %v977_v57 = vunpack.i.h.bf16 %v975_v16 }
  0x95   : > { %v960_v34 = vunpack.i.l.bf16 %v959_v22  ;;  %v961_v55 = vunpack.i.h.bf16 %v959_v22  ;;  %v521_v16 = vperm.slane %v511_v60, 0  ;;  %v494_v29 = vmul.f32 %v493_v32, %v492_v5 }
  0x96   : > { %v346_v19 = vadd.f32 %v345_v18, %v335_v21  ;;  %v441_v59 = vmul.f32 %v976_v49, %v436_v42  ;;  %v520_v18 = vperm.slane %v988_v6, %v1253_v58  ;;  %v532_v22 = vperm.slane %v511_v60, 1 }
  0x97   : > { %v422_v44 = vperm.slane %v960_v34, %v1253_v58  ;;  %v481_v0 = vperm.slane %v961_v55, %v1253_v58  ;;  %v1305_v17 = vpop.permute.xlu2 %1019  ;;  %v543_v34 = vperm.slane %v511_v60, 2  ;;  %v554_v13 = vperm.slane %v511_v60, 3 }
  0x98   : > { %v363_v27 = vadd.f32 %v362_v25, %v346_v19  ;;  %v522_v26 = vmul.f32 %v521_v16, %v520_v18  ;;  %v1021_v55 = vunpack.i.l.bf16 %v1305_v17  ;;  %v1022_v6 = vunpack.i.h.bf16 %v1305_v17 }
  0x99   : > { %v427_v41 = vmul.f32 %v966_v46, %v422_v44  ;;  %v483_v9 = vmul.f32 %v482_v30, %v481_v0  ;;  %v1005_v30 = vunpack.i.l.bf16 %v1287_v53 }
  0x9a   : > { %v374_v36 = vadd.f32 %v373_v31, %v363_v27  ;;  %v628_v63 = vperm.slane %v1021_v55, %v1253_v58 }
  0x9b   : > { %v1280_v38 = vpop.permute.xlu0 %991 }
  0x9c   : > { %v385_v40 = vadd.f32 %v384_v20, %v374_v36  ;;  %v993_v10 = vunpack.i.l.bf16 %v1280_v38  ;;  %v989_v20 = vunpack.i.h.bf16 %v1272_v24  ;;  %v553_v36 = vperm.slane %v1005_v30, %v1253_v58 }
  0x9d   : > { %v981_v47 = vpop.permute.xlu1 %980  ;;  %v1006_v24 = vunpack.i.h.bf16 %v1287_v53 }
  0x9e   : > { %v396_v50 = vadd.f32 %v395_v39, %v385_v40  ;;  %v982_v54 = vunpack.i.l.bf16 %v981_v47  ;;  %v983_v1 = vunpack.i.h.bf16 %v981_v47  ;;  %v531_v15 = vperm.slane %v993_v10, %v1253_v58 }
  0x9f   : > { %v994_v39 = vunpack.i.h.bf16 %v1280_v38  ;;  %v568_v47 = vperm.slane %v989_v20, %v1253_v58 }
  0xa0   : > { %v414_v56 = vadd.f32 %v413_v48, %v396_v50  ;;  %v450_v51 = vperm.slane %v982_v54, %v1253_v58  ;;  %v503_v11 = vperm.slane %v983_v1, %v1253_v58  ;;  %v533_v35 = vmul.f32 %v532_v22, %v531_v15 }
  0xa1   : > { %v555_v48 = vmul.f32 %v554_v13, %v553_v36  ;;  %v582_v50 = vperm.slane %v994_v39, %v1253_v58 }
  0xa2   : > { %v428_v61 = vadd.f32 %v427_v41, %v414_v56  ;;  %v455_v3 = vmul.f32 %v977_v57, %v450_v51  ;;  %v505_v19 = vmul.f32 %v504_v33, %v503_v11  ;;  %v1037_v33 = vpop.permute.xlu2 %1036 }
  0xa3   : > { %v1009_v62 = vpop.permute.xlu0 %1008  ;;  %v1039_v22 = vunpack.i.h.bf16 %v1037_v33 }
  0xa4   : > { %v442_v2 = vadd.f32 %v441_v59, %v428_v61  ;;  %v1010_v40 = vunpack.i.l.bf16 %v1009_v62  ;;  %v1011_v28 = vunpack.i.h.bf16 %v1009_v62  ;;  %v610_v61 = vperm.slane %v1006_v24, %v1253_v58 }
  0xa5   : > { %v1038_v62 = vunpack.i.l.bf16 %v1037_v33  ;;  %v712_v20 = vperm.slane %v1039_v22, %v1253_v58 }
  0xa6   : > { %v456_v7 = vadd.f32 %v455_v3, %v442_v2  ;;  %v998_v8 = vpop.permute.xlu1 %997  ;;  %v573_v54 = vmul.f32 %v1010_v40, %v568_v47  ;;  %v587_v43 = vmul.f32 %v1011_v28, %v582_v50 }
  0xa7   : > { %v999_v21 = vunpack.i.l.bf16 %v998_v8  ;;  %v1000_v42 = vunpack.i.h.bf16 %v998_v8 }
  0xa8   : > { %v473_v12 = vadd.f32 %v472_v4, %v456_v7  ;;  %v654_v7 = vperm.slane %v1038_v62, %v1253_v58 }
  0xa9   : > { %v542_v31 = vperm.slane %v999_v21, %v1253_v58  ;;  %v596_v51 = vperm.slane %v1000_v42, %v1253_v58  ;;  %v684_v21 = vperm.slane %v1022_v6, %v1253_v58 }
  0xaa   : > { %v484_v14 = vadd.f32 %v483_v9, %v473_v12  ;;  %v1053_v8 = vpop.permute.xlu2 %1052 }
  0xab   : > { %v1025_v23 = vpop.permute.xlu0 %1024  ;;  %v544_v45 = vmul.f32 %v543_v34, %v542_v31  ;;  %v1054_v15 = vunpack.i.l.bf16 %v1053_v8 }
  0xac   : > { %v495_v25 = vadd.f32 %v494_v29, %v484_v14  ;;  %v1026_v0 = vunpack.i.l.bf16 %v1025_v23  ;;  %v1027_v60 = vunpack.i.h.bf16 %v1025_v23 }
  0xae   : > { %v506_v27 = vadd.f32 %v505_v19, %v495_v25  ;;  %v1014_v32 = vpop.permute.xlu1 %1013  ;;  %v632_v9 = vmul.f32 %v1026_v0, %v628_v63 }
  0xaf   : > { %v1015_v38 = vunpack.i.l.bf16 %v1014_v32  ;;  %v1016_v52 = vunpack.i.h.bf16 %v1014_v32 }
  0xb0   : > { %v523_v37 = vadd.f32 %v522_v26, %v506_v27  ;;  %v1055_v26 = vunpack.i.h.bf16 %v1053_v8 }
  0xb1   : > { %v601_v53 = vmul.f32 %v1015_v38, %v596_v51  ;;  %v615_v4 = vmul.f32 %v1016_v52, %v610_v61 }
  0xb2   : > { %v534_v44 = vadd.f32 %v533_v35, %v523_v37  ;;  %v1064_v13 = vpop.permute.xlu2 %1063  ;;  %v689_v35 = vmul.f32 %v1054_v15, %v684_v21 }
  0xb3   : > { %v1042_v46 = vpop.permute.xlu0 %1041  ;;  %v1066_v55 = vunpack.i.h.bf16 %v1064_v13 }
  0xb4   : > { %v545_v49 = vadd.f32 %v544_v45, %v534_v44  ;;  %v1043_v11 = vunpack.i.l.bf16 %v1042_v46  ;;  %v1044_v30 = vunpack.i.h.bf16 %v1042_v46  ;;  %v1065_v46 = vunpack.i.l.bf16 %v1064_v13 }
  0xb6   : > { %v556_v56 = vadd.f32 %v555_v48, %v545_v49  ;;  %v1031_v41 = vpop.permute.xlu1 %1030  ;;  %v658_v25 = vmul.f32 %v1043_v11, %v654_v7 }
  0xb7   : > { %v1032_v59 = vunpack.i.l.bf16 %v1031_v41  ;;  %v1033_v29 = vunpack.i.h.bf16 %v1031_v41 }
  0xb8   : > { %v574_v57 = vadd.f32 %v573_v54, %v556_v56 }
  0xb9   : > { %v641_v5 = vperm.slane %v1032_v59, %v1253_v58  ;;  %v698_v23 = vperm.slane %v1033_v29, %v1253_v58 }
  0xba   : > { %v588_v1 = vadd.f32 %v587_v43, %v574_v57  ;;  %v1070_v50 = vpop.permute.xlu2 %1069 }
  0xbb   : > { %v1058_v2 = vpop.permute.xlu0 %1057  ;;  %v645_v18 = vmul.f32 %v1027_v60, %v641_v5  ;;  %v703_v39 = vmul.f32 %v1055_v26, %v698_v23  ;;  %v1072_v43 = vunpack.i.h.bf16 %v1070_v50  ;;  %v1071_v51 = vunpack.i.l.bf16 %v1070_v50 }
  0xbc   : > { %v602_v3 = vadd.f32 %v601_v53, %v588_v1  ;;  %v1059_v36 = vunpack.i.l.bf16 %v1058_v2  ;;  %v1060_v40 = vunpack.i.h.bf16 %v1058_v2 }
  0xbe   : > { %v616_v10 = vadd.f32 %v615_v4, %v602_v3  ;;  %v717_v33 = vmul.f32 %v1059_v36, %v712_v20 }
  0xbf   : > { %v1048_v12 = vpop.permute.xlu1 %1047 }
  0xc0   : > { %v633_v16 = vadd.f32 %v632_v9, %v616_v10  ;;  %v1049_v14 = vunpack.i.l.bf16 %v1048_v12  ;;  %v1050_v27 = vunpack.i.h.bf16 %v1048_v12 }
  0xc2   : > { %v646_v19 = vadd.f32 %v645_v18, %v633_v16  ;;  %v667_v17 = vperm.slane %v1049_v14, %v1253_v58  ;;  %v726_v44 = vperm.slane %v1050_v27, %v1253_v58 }
  0xc3   : > { %v752_v32 = vpop.permute.xlu0 %751 }
  0xc4   : > { %v659_v31 = vadd.f32 %v658_v25, %v646_v19  ;;  %v671_v34 = vmul.f32 %v1044_v30, %v667_v17  ;;  %v731_v42 = vmul.f32 %v1060_v40, %v726_v44  ;;  %v757_v54 = vperm.slane %v752_v32, %v1253_v58 }
  0xc6   : > { %v672_v37 = vadd.f32 %v671_v34, %v659_v31  ;;  %v761_v59 = vmul.f32 %v1066_v55, %v757_v54 }
  0xc8   : > { %v690_v45 = vadd.f32 %v689_v35, %v672_v37  ;;  %v739_v28 = vpop.permute.xlu1 %738 }
  0xc9   : > { %v744_v48 = vperm.slane %v739_v28, %v1253_v58 }
  0xca   : > { %v704_v47 = vadd.f32 %v703_v39, %v690_v45 }
  0xcb   : > { %v748_v38 = vmul.f32 %v1065_v46, %v744_v48 }
  0xcc   : > { %v718_v49 = vadd.f32 %v717_v33, %v704_v47  ;;  %v778_v24 = vpop.permute.xlu0 %777 }
  0xcd   : > { %v783_v52 = vperm.slane %v778_v24, %v1253_v58 }
  0xce   : > { %v732_v56 = vadd.f32 %v731_v42, %v718_v49 }
  0xcf   : > { %v787_v63 = vmul.f32 %v1072_v43, %v783_v52 }
  0xd0   : > { %v749_v41 = vadd.f32 %v748_v38, %v732_v56 }
  0xd1   : > { %v765_v57 = vpop.permute.xlu1 %764 }
  0xd2   : > { %v770_v61 = vperm.slane %v765_v57, %v1253_v58  ;;  %v762_v0 = vadd.f32 %v761_v59, %v749_v41 }
  0xd4   : > { %v774_v62 = vmul.f32 %v1071_v51, %v770_v61 }
  0xd6   : > { %v775_v1 = vadd.f32 %v774_v62, %v762_v0 }
  0xd8   : > { %v788_v53 = vadd.f32 %v787_v63, %v775_v1 }
  0xda   : > { %v793_v2 = vpop.permute.xlu1 %792 }
  0xdb   : > { %v795_v3 = vadd.f32 %v793_v2, %v788_v53 }
  0xdd   : > { %vm796_vm1 = vcmp.ge.f32.partialorder %v795_v3, 0.0  ;;  %v797_v4 = vmul.f32 0.01, %v795_v3 }
  0xdf   : > { %v798_v5 = vsel %vm796_vm1, %v795_v3, %v797_v4 }
  0xe0   : > { %800 = vst.msk [vmem:[%s297_s16] sm:$0xf] %vm799_vm0, %v798_v5 }
  0xe1 PF: > { %s16_s21 = sadd.s32 1, %s1082_s21  }
  0xe2   : > { %p13_p4 = scmp.ge.s32.totalorder %s16_s21, 4  }
  0xe4   :  { %15 = sbr.rel (!%p13_p4) target bundleno = 1 (0x1), region = 91 }

</bundles_post_ra>
